<compile_context>
chip_gen: v5e
topology: v5e:2x2
jax: 0.10.0
libtpu: 0.0.40
codegen_flags: <defaults>
</compile_context>

<pallas_src>
import functools
import numpy as np
import jax
import jax.numpy as jnp
from jax.experimental import pallas as pl
from jax.experimental.pallas import tpu as pltpu


# ----------------------------- Kernel A: get_hrt rs --------------------------
def hrt_rs_kernel(h_att_ref, t_att_ref, seq_ref, rs_ref):
    # h_att_ref / t_att_ref: (H, TR, C) bf16 ; seq_ref: (C, D) bf16 ; rs_ref: (TR, D) f32
    h = h_att_ref[...].astype(jnp.float32)
    t = t_att_ref[...].astype(jnp.float32)
    num_heads = h_att_ref.shape[0]
    s = jnp.sum(h * t, axis=0)                               # (TR, C) sum over heads
    # mean over heads + row normalization folded into one scale:
    #   (s/H) / (sum(s)/H + 1e-5)  ==  s / (sum(s) + H*1e-5)
    inv = pl.reciprocal(jnp.sum(s, axis=1, keepdims=True) + num_heads * 1e-5,
                        approx=True)
    ht_att = (s * inv).astype(jnp.bfloat16)
    rs_ref[...] = jnp.dot(ht_att, seq_ref[...],
                          preferred_element_type=jnp.float32)


def hrt_rs(h_att, t_att, seq, *, tr=128):
    # h_att/t_att: [n, H, Rp, C] bf16; seq: [n, C, D] bf16 -> rs: [n, Rp, D] f32
    n, H, Rp, C = h_att.shape
    D = seq.shape[-1]
    grid = (n, Rp // tr)
    return pl.pallas_call(
        hrt_rs_kernel,
        out_shape=jax.ShapeDtypeStruct((n, Rp, D), jnp.float32),
        grid=grid,
        in_specs=[
            pl.BlockSpec((None, H, tr, C), lambda b, r: (b, 0, r, 0)),
            pl.BlockSpec((None, H, tr, C), lambda b, r: (b, 0, r, 0)),
            pl.BlockSpec((None, C, D), lambda b, r: (b, 0, 0)),
        ],
        out_specs=pl.BlockSpec((None, tr, D), lambda b, r: (b, r, 0)),
        compiler_params=pltpu.CompilerParams(
            dimension_semantics=("parallel", "parallel"),
            vmem_limit_bytes=48 * 1024 * 1024),
    )(h_att, t_att, seq)


# ----------------------- Kernel B: block bilinear + get_label ----------------
def bilinear_kernel(hs_ref, ts_ref, w_ref, b_ref, logits_ref, preds_ref, *, nl):
    # hs_ref/ts_ref: (TR, bs) bf16 ; w_ref: (bs*bs, NLp) bf16 ; b_ref: (1, NLp) f32
    # logits_ref/preds_ref: (TR, NLp) f32 ; logits_ref doubles as the K accumulator.
    k = pl.program_id(1)

    @pl.when(k == 0)
    def _():
        logits_ref[...] = jnp.broadcast_to(b_ref[...], logits_ref.shape)

    hs_k = hs_ref[...]
    ts_k = ts_ref[...]
    tr, bs = hs_k.shape
    # in-kernel block outer product: bl[r, i*bs + j] = hs[r, i] * ts[r, j]
    bl = (hs_k[:, :, None] * ts_k[:, None, :]).reshape(tr, bs * bs)
    logits_ref[...] += jnp.dot(bl, w_ref[...], preferred_element_type=jnp.float32)

    @pl.when(k == pl.num_programs(1) - 1)
    def _():
        # ATLoss.get_label with num_labels == -1 (default in this module's ctor).
        # TODO(synk): the num_labels>0 top-k branch of ATLoss.get_label is not implemented.
        logits = logits_ref[...]
        col = jax.lax.broadcasted_iota(jnp.int32, logits.shape, 1)
        valid = col < nl                                   # mask padded label lanes
        th = logits[:, 0:1]
        pos = jnp.logical_and(logits > th, valid).astype(jnp.float32)
        none_pos = (jnp.sum(pos, axis=1, keepdims=True) == 0.0).astype(jnp.float32)
        preds_ref[...] = jnp.where(col == 0, none_pos, pos)


def bilinear_classify(hs_g, ts_g, w_p, b_p, nl, *, tr=128):
    # hs_g/ts_g: [K, Rtp, bs] bf16 ; w_p: [K*bs*bs, NLp] bf16 ; b_p: [1, NLp] f32
    K, Rtp, bs = hs_g.shape
    NLp = w_p.shape[1]
    grid = (Rtp // tr, K)                                  # K innermost (accumulator)
    kernel = functools.partial(bilinear_kernel, nl=nl)
    return pl.pallas_call(
        kernel,
        out_shape=(jax.ShapeDtypeStruct((Rtp, NLp), jnp.float32),
                   jax.ShapeDtypeStruct((Rtp, NLp), jnp.float32)),
        grid=grid,
        in_specs=[
            pl.BlockSpec((None, tr, bs), lambda r, k: (k, r, 0)),
            pl.BlockSpec((None, tr, bs), lambda r, k: (k, r, 0)),
            pl.BlockSpec((bs * bs, NLp), lambda r, k: (k, 0)),
            pl.BlockSpec((1, NLp), lambda r, k: (0, 0)),
        ],
        out_specs=(pl.BlockSpec((tr, NLp), lambda r, k: (r, 0)),
                   pl.BlockSpec((tr, NLp), lambda r, k: (r, 0))),
        compiler_params=pltpu.CompilerParams(
            dimension_semantics=("parallel", "arbitrary"),
            vmem_limit_bytes=48 * 1024 * 1024),
    )(hs_g, ts_g, w_p, b_p)


# ------------------------------ Glue (plain JAX) -----------------------------
def aggregate_entities(seq_i, attn_i, entity_pos_i, offset, H, C, D):
    """Matches DocREModel.get_hrt per-entity aggregation (logsumexp / mean)."""
    embs, atts = [], []
    for e in entity_pos_i:
        if len(e) > 1:
            pos = [s + offset for (s, _end) in e if s + offset < C]
            if len(pos) > 0:
                idx = jnp.asarray(pos, dtype=jnp.int32)
                e_emb = jax.scipy.special.logsumexp(seq_i[idx], axis=0)       # [D]
                e_att = jnp.mean(attn_i[:, idx, :], axis=1)                   # [H, C]
            else:
                e_emb = jnp.zeros((D,), jnp.float32)
                e_att = jnp.zeros((H, C), jnp.float32)
        else:
            s, _end = e[0]
            if s + offset < C:
                e_emb = seq_i[s + offset]
                e_att = attn_i[:, s + offset, :]
            else:
                e_emb = jnp.zeros((D,), jnp.float32)
                e_att = jnp.zeros((H, C), jnp.float32)
        embs.append(e_emb)
        atts.append(e_att)
    return jnp.stack(embs, axis=0), jnp.stack(atts, axis=0)


def pad_rows(x, rp):
    pad = rp - x.shape[0]
    if pad == 0:
        return x
    return jnp.concatenate(
        [x, jnp.zeros((pad,) + x.shape[1:], x.dtype)], axis=0)


def docre_forward(sequence_output, attention, entity_pos, hts,
                  bilinear_w, bilinear_b, *, emb_size, block_size, tr=128):
    """DocREModel.forward (classification branch), labels=None, num_labels=-1."""
    n, C, D = sequence_output.shape
    H = attention.shape[1]
    offset = 1  # transformer_type == 'bert'

    hs_list, ts_list, hatt_list, tatt_list, r_counts = [], [], [], [], []
    for i in range(n):
        e_embs, e_atts = aggregate_entities(
            sequence_output[i], attention[i], entity_pos[i], offset, H, C, D)
        ht_i = jnp.asarray(hts[i], dtype=jnp.int32)
        hs_list.append(e_embs[ht_i[:, 0]])
        ts_list.append(e_embs[ht_i[:, 1]])
        hatt_list.append(e_atts[ht_i[:, 0]])
        tatt_list.append(e_atts[ht_i[:, 1]])
        r_counts.append(len(hts[i]))

    # ---- Kernel A: rs. Heads moved off the sublane axis, bf16 streams. ----
    Rp = max(tr, int(np.ceil(max(r_counts) / tr) * tr))
    h_att_all = jnp.stack([pad_rows(a, Rp) for a in hatt_list], axis=0)   # [n,Rp,H,C]
    t_att_all = jnp.stack([pad_rows(a, Rp) for a in tatt_list], axis=0)
    h_att_all = jnp.transpose(h_att_all, (0, 2, 1, 3)).astype(jnp.bfloat16)  # [n,H,Rp,C]
    t_att_all = jnp.transpose(t_att_all, (0, 2, 1, 3)).astype(jnp.bfloat16)
    seq_bf16 = sequence_output.astype(jnp.bfloat16)
    rs_all = hrt_rs(h_att_all, t_att_all, seq_bf16, tr=tr)                # [n,Rp,D] f32
    rs = jnp.concatenate([rs_all[i, :r_counts[i]] for i in range(n)], axis=0)

    # ---- Kernel B: block bilinear classifier + ATLoss.get_label ----
    hs = jnp.concatenate(hs_list, axis=0)   # [R, D]
    ts = jnp.concatenate(ts_list, axis=0)
    R = hs.shape[0]
    K = emb_size // block_size
    NL = bilinear_w.shape[0]
    NLp = int(np.ceil(NL / 128) * 128)      # lane-dense label dim

    Rtp = max(tr, int(np.ceil(R / tr) * tr))
    hs_p = pad_rows(hs, Rtp)
    ts_p = pad_rows(ts, Rtp)
    # k-grouped layout: hs_g[k, r, i] = hs[r, k*bs + i]   (expansion happens in-kernel)
    hs_g = jnp.transpose(hs_p.reshape(Rtp, K, block_size), (1, 0, 2)).astype(jnp.bfloat16)
    ts_g = jnp.transpose(ts_p.reshape(Rtp, K, block_size), (1, 0, 2)).astype(jnp.bfloat16)

    w_p = jnp.pad(bilinear_w.T, ((0, 0), (0, NLp - NL))).astype(jnp.bfloat16)  # [DB,NLp]
    b_p = jnp.pad(bilinear_b, (0, NLp - NL)).reshape(1, NLp).astype(jnp.float32)

    logits_p, preds_p = bilinear_classify(hs_g, ts_g, w_p, b_p, NL, tr=tr)
    logits = logits_p[:R, :NL]
    preds = preds_p[:R, :NL]
    return preds, logits, rs


# ----------------------------------- Driver ----------------------------------
if __name__ == "__main__":
    # Small config consistent with the module: hidden == emb_size, NL = num_labels
    n, C, D, H = 2, 128, 32, 4
    emb_size, block_size = 32, 8
    num_rel_labels = 8

    key = jax.random.PRNGKey(0)
    k_seq, k_att, k_w = jax.random.split(key, 3)

    # Synthetic encoder outputs (stand-ins for encode()/process_long_input).
    sequence_output = jax.random.normal(k_seq, (n, C, D), dtype=jnp.float32)
    attention = jax.nn.softmax(
        jax.random.normal(k_att, (n, H, C, C), dtype=jnp.float32), axis=-1)

    # Entity mention positions (start, end) and head/tail pair lists per doc.
    entity_pos = [
        [[(2, 4), (10, 12)], [(20, 22)], [(40, 42), (100, 102), (60, 62)]],
        [[(5, 7)], [(30, 32), (31, 33)], [(70, 72), (127, 129)]],  # (127,..) filtered
    ]
    hts = [
        [(h, t) for h in range(3) for t in range(3) if h != t],
        [(h, t) for h in range(3) for t in range(3) if h != t],
    ]

    # Deterministic bilinear classifier parameters (nn.Linear(emb*bs, num_labels)).
    bilinear_w = 0.02 * jax.random.normal(
        k_w, (num_rel_labels, emb_size * block_size), dtype=jnp.float32)
    bilinear_b = jnp.zeros((num_rel_labels,), dtype=jnp.float32)

    preds, logits, rs = docre_forward(
        sequence_output, attention, entity_pos, hts,
        bilinear_w, bilinear_b, emb_size=emb_size, block_size=block_size, tr=128)

    jax.block_until_ready((preds, logits, rs))
    assert preds.shape == (12, num_rel_labels)
    assert logits.shape == (12, num_rel_labels)
    assert rs.shape == (12, D)
    print("KERNEL_OK")
</pallas_src>

<mosaic_0001>
module attributes {stable_mosaic.version = 11 : i64} {
  func.func @hrt_rs_kernel(%arg0: i32, %arg1: i32, %arg2: memref<1x4x128x128xbf16, #tpu.memory_space<vmem>>, %arg3: memref<1x4x128x128xbf16, #tpu.memory_space<vmem>>, %arg4: memref<1x128x32xbf16, #tpu.memory_space<vmem>>, %arg5: memref<1x128x32xf32, #tpu.memory_space<vmem>>) attributes {dimension_semantics = [#tpu.dimension_semantics<parallel>, #tpu.dimension_semantics<parallel>], iteration_bounds = array<i64: 2, 1>, scalar_prefetch = 0 : i64, scratch_operands = 0 : i64, tpu.core_type = #tpu.core_type<tc>, window_params = [{transform_indices = @transform_0, window_bounds = array<i64: 1, 4, 128, 128>}, {transform_indices = @transform_1, window_bounds = array<i64: 1, 4, 128, 128>}, {transform_indices = @transform_2, window_bounds = array<i64: 1, 128, 32>}, {transform_indices = @transform_3, window_bounds = array<i64: 1, 128, 32>}]} {
    %c0 = arith.constant 0 : index
    %c0_0 = arith.constant 0 : index
    %c0_1 = arith.constant 0 : index
    %c0_2 = arith.constant 0 : index
    %0 = vector.load %arg2[%c0, %c0_0, %c0_1, %c0_2] : memref<1x4x128x128xbf16, #tpu.memory_space<vmem>>, vector<1x4x128x128xbf16>
    %1 = vector.shape_cast %0 : vector<1x4x128x128xbf16> to vector<4x128x128xbf16>
    %2 = arith.extf %1 : vector<4x128x128xbf16> to vector<4x128x128xf32>
    %c0_3 = arith.constant 0 : index
    %c0_4 = arith.constant 0 : index
    %c0_5 = arith.constant 0 : index
    %c0_6 = arith.constant 0 : index
    %3 = vector.load %arg3[%c0_3, %c0_4, %c0_5, %c0_6] : memref<1x4x128x128xbf16, #tpu.memory_space<vmem>>, vector<1x4x128x128xbf16>
    %4 = vector.shape_cast %3 : vector<1x4x128x128xbf16> to vector<4x128x128xbf16>
    %5 = arith.extf %4 : vector<4x128x128xbf16> to vector<4x128x128xf32>
    %6 = arith.mulf %2, %5 : vector<4x128x128xf32>
    %cst = arith.constant dense<0.000000e+00> : vector<128x128xf32>
    %7 = vector.multi_reduction <add>, %6, %cst [0] : vector<4x128x128xf32> to vector<128x128xf32>
    %cst_7 = arith.constant dense<0.000000e+00> : vector<128xf32>
    %8 = vector.multi_reduction <add>, %7, %cst_7 [1] : vector<128x128xf32> to vector<128xf32>
    %9 = vector.shape_cast %8 : vector<128xf32> to vector<128x1xf32>
    %cst_8 = arith.constant 4.000000e-05 : f32
    %10 = vector.broadcast %cst_8 : f32 to vector<128x1xf32>
    %11 = arith.addf %9, %10 : vector<128x1xf32>
    %12 = tpu.reciprocal %11 {approx = true} : vector<128x1xf32> -> vector<128x1xf32>
    %13 = vector.broadcast %12 : vector<128x1xf32> to vector<128x128xf32>
    %14 = arith.mulf %7, %13 : vector<128x128xf32>
    %15 = arith.truncf %14 : vector<128x128xf32> to vector<128x128xbf16>
    %c0_9 = arith.constant 0 : index
    %c0_10 = arith.constant 0 : index
    %c0_11 = arith.constant 0 : index
    %16 = vector.load %arg4[%c0_9, %c0_10, %c0_11] : memref<1x128x32xbf16, #tpu.memory_space<vmem>>, vector<1x128x32xbf16>
    %17 = vector.shape_cast %16 : vector<1x128x32xbf16> to vector<128x32xbf16>
    %cst_12 = arith.constant dense<0.000000e+00> : vector<128x32xf32>
    %18 = tpu.matmul %15, %17, %cst_12 {dimension_numbers = #tpu.dot_dimension_numbers<[1], [0], [0], [1], [0, 0, 1, 1], [], []>} : vector<128x128xbf16>, vector<128x32xbf16>, vector<128x32xf32> -> vector<128x32xf32>
    %c0_13 = arith.constant 0 : index
    %c0_14 = arith.constant 0 : index
    %c0_15 = arith.constant 0 : index
    %19 = vector.load %arg5[%c0_13, %c0_14, %c0_15] : memref<1x128x32xf32, #tpu.memory_space<vmem>>, vector<1x128x32xf32>
    %20 = vector.shape_cast %19 : vector<1x128x32xf32> to vector<128x32xf32>
    %21 = vector.shape_cast %18 : vector<128x32xf32> to vector<1x128x32xf32>
    tpu.vector_store %arg5[%c0_13, %c0_14, %c0_15], %21 {strides = array<i32>} : memref<1x128x32xf32, #tpu.memory_space<vmem>>, vector<1x128x32xf32>,
    return
  }
  func.func @transform_0(%arg0: i32, %arg1: i32) -> (i32, i32, i32, i32) {
    %c0_i32 = arith.constant 0 : i32
    %c0_i32_0 = arith.constant 0 : i32
    %c0_i32_1 = arith.constant 0 : i32
    return %arg0, %c0_i32, %arg1, %c0_i32_0 : i32, i32, i32, i32
  }
  func.func @transform_1(%arg0: i32, %arg1: i32) -> (i32, i32, i32, i32) {
    %c0_i32 = arith.constant 0 : i32
    %c0_i32_0 = arith.constant 0 : i32
    %c0_i32_1 = arith.constant 0 : i32
    return %arg0, %c0_i32, %arg1, %c0_i32_0 : i32, i32, i32, i32
  }
  func.func @transform_2(%arg0: i32, %arg1: i32) -> (i32, i32, i32) {
    %c0_i32 = arith.constant 0 : i32
    %c0_i32_0 = arith.constant 0 : i32
    %c0_i32_1 = arith.constant 0 : i32
    return %arg0, %c0_i32, %c0_i32_0 : i32, i32, i32
  }
  func.func @transform_3(%arg0: i32, %arg1: i32) -> (i32, i32, i32) {
    %c0_i32 = arith.constant 0 : i32
    %c0_i32_0 = arith.constant 0 : i32
    return %arg0, %arg1, %c0_i32 : i32, i32, i32
  }
}

</mosaic_0001>

<bundles_post_ra>
// kernel: tpu_custom_call.1
= control target key start
LH: loop header
LB: loop body
LE: loop exit
PB: predicated region body
PF: predicated region fallthrough
CT: control target
= control target key end

     0   :  { %8 = vsyncpa [#allocation3], 0  ;;  %s2115_s0 = inlined_call_operand.hbm [shape: bf16[2,4,128,128], index: 0, kind: input, shape index: {}]   ;;  %s2116_s1 = inlined_call_operand.hbm [shape: bf16[2,4,128,128], index: 1, kind: input, shape index: {}]   ;;  %s2117_s2 = inlined_call_operand.vmem [shape: bf16[2,128,32], index: 2, kind: input, shape index: {}]   ;;  %s2118_s3 = inlined_call_operand.vmem [shape: f32[2,128,32], index: 3, kind: output, shape index: {}]  }
   0x1   :  { %10 = vsyncpa [#allocation3 + $0x1], 0 }
   0x2   :  { %11 = vsyncpa [#allocation5], 0 }
   0x3   :  { %13 = vsyncpa [#allocation5 + $0x1], 0  ;;  %s1644_s12 = smov 0   ;;  %s1646_s13 = smov 0  }
   0x4   :  { %s1648_s14 = smov 0   ;;  %s1650_s15 = smov 0  }
   0x5   :  { %s1652_s16 = smov 0   ;;  %s1654_s17 = smov 0  }
   0x6 LB: > { %s1007_s18 = sadd.s32 4294967295, %s1620_s17   ;;  %s31_s19 = sadd.s32 1, %s1616_s16  ;;  %s1620_s17 = sphi %s1654_s17, %s19_s17   ;;  %s1616_s16 = sphi %s1652_s16, %s2126_s16   ;;  %s1612_s15 = sphi %s1650_s15, %s2125_s15   ;;  %s1608_s14 = sphi %s1648_s14, %s2124_s14   ;;  %s1604_s13 = sphi %s1646_s13, %s2123_s13   ;;  %s1600_s12 = sphi %s1644_s12, %s2122_s12  }
   0x7   : > { %p33_p0 = scmp.ge.s32.totalorder %s31_s19, 2  ;;  %s40_s20 = sadd.s32 1, %s1608_s14 }
   0x8   : > { %p47_p1 = scmp.ne.s32.totalorder %s1608_s14, %s1604_s13  ;;  %p48_p2 = scmp.eq.s32.totalorder %s1620_s17, 0 }
   0x9   : > { %s2128_s19 = smov (%p33_p0, %s31_s19), 0  ;;  %p53_p4 = scmp.ne.s32.totalorder %s1604_s13, %s1600_s12 }
   0xa   : > { %p1680_p3 = por %p48_p2, %p47_p1  ;;  %s35_s22 = ssub.s32 %s1616_s16, %s2128_s19 }
   0xb   : > { %p54_p5 = scmp.eq.s32.totalorder %s1007_s18, 0  ;;  %p38_p6 = scmp.eq.s32.totalorder %s35_s22, 0 }
   0xc   : > { %p1423_p8 = scmp.lt.s32.totalorder %s1620_s17, 2  ;;  %s1696_s25 = sand.u32 1, %s1608_s14  }
   0xd   : > { %p1687_p7 = por %p54_p5, %p53_p4  ;;  %s1058_s26 = sshll.u32 %s1616_s16, 8 }
   0xe   : > { %s1693_s24 = scalar_select %p38_p6, %s1608_s14, %s40_s20  }
   0xf   : > { %s1011_s27 = sshll.u32 %s1696_s25, 8  ;;  %s170_s30 = scalar_lea.hbm %s2115_s0, %s1058_s26 }
  0x10   : > { %s171_s4 = sshll.u32 %s170_s30, 4  ;;  %s163_s5 = scalar_lea.vmem [#allocation2], %s1011_s27  ;;  %s172_s4 = int_to_ptr.hbm [resolvable:$true] %s171_s4 }
  0x11   : > { %s173_s6 = sshll.u32 %s163_s5, 4  ;;  %p1705_p9 = pnand %p1423_p8, %p1680_p3  ;;  %s174_s6 = int_to_ptr.vmem [resolvable:$true] %s173_s6 }
  0x12   : > { %p1017_p10 = scmp.ge.s32.totalorder %s1620_s17, 1  ;;  %p213_p11 = scmp.lt.s32.totalorder %s1620_s17, 3 }
  0x13   : > { %s160_s8 = scalar_lea.sflag [#allocation3], %s1696_s25  ;;  %s1622_s9 = smov 64  }
  0x14   : > { %s1623_s10 = smov 4   ;;  %p214_p12 = pnand %p1017_p10, %p213_p11 }
  0x15   : > { %1419 = dma.hbm_to_vmem [thread:$0]  (!%p1705_p9), %s172_s4, 4096, %s174_s6, %s160_s8, %s1622_s9, %s1622_s9, %s1623_s10  }
  0x16   : > { %s194_s18 = scalar_lea.hbm %s2116_s1, %s1058_s26  ;;  %s187_s21 = scalar_lea.vmem [#allocation4], %s1011_s27 }
  0x17   : > { %s195_s20 = sshll.u32 %s194_s18, 4  ;;  %s197_s22 = sshll.u32 %s187_s21, 4  ;;  %s196_s20 = int_to_ptr.hbm [resolvable:$true] %s195_s20  ;;  %s198_s22 = int_to_ptr.vmem [resolvable:$true] %s197_s22 }
  0x18   : > { %s184_s28 = scalar_lea.sflag [#allocation5], %s1696_s25  ;;  %217 = sbr.rel (%p214_p12) target bundleno = 366 (0x16e), region = 32 }
  0x19   : > { %1422 = dma.hbm_to_vmem [thread:$0]  (!%p1705_p9), %s196_s20, 4096, %s198_s22, %s184_s28, %s1622_s9, %s1622_s9, %s1623_s10  }
  0x1a   : > { %s219_s29 = sand.u32 (!%p214_p12), 1, %s1604_s13  }
  0x1b   : > { %s1018_s30 = sshll.u32 (!%p214_p12), %s219_s29, 8  ;;  %s220_s5 = scalar_lea.sflag (!%p214_p12), [#allocation3], %s219_s29 }
  0x1c   : > { %s1721_s4 = scalar_lea.vmem (!%p214_p12), [#allocation2], %s1018_s30 }
  0x1d   : > { %1591 = dma.done.wait (%p1687_p7), %s220_s5, 4096  }
  0x1e   : > { %1593 = vsyncadd (%p1687_p7), %s220_s5, 4294963200  ;;  %s230_s26 = scalar_lea.sflag [#allocation5], %s219_s29  ;;  %s1727_s27 = scalar_lea.vmem [#allocation4], %s1018_s30 }
  0x1f   : > { %1595 = dma.done.wait (%p1687_p7), %s230_s26, 4096  }
  0x20   : > { %1597 = vsyncadd (%p1687_p7), %s230_s26, 4294963200  ;;  %v1734_v0 = vld [vmem:[%s1721_s4 + $0x30] sm:$0xff]   ;;  %v1765_v15 = vld [vmem:[%s1721_s4 + $0x20] sm:$0xff]   ;;  %p273_p13 = scmp.lt.s32.totalorder %s1612_s15, 1  ;;  %vm857_vm0 = vcmask 261120  }
  0x21   : > { %v1737_v1 = vld [vmem:[%s1721_s4 + $0x70] sm:$0xff]   ;;  %v1096_v3 = vunpack.c.l.bf16 %v1734_v0  ;;  %v1097_v9 = vunpack.c.h.bf16 %v1734_v0  ;;  %v1088_v19 = vunpack.c.l.bf16 %v1765_v15  ;;  %v1772_v20 = vld [vmem:[%s1721_s4 + $0x60] sm:$0xff]  }
  0x22   : > { %v1740_v2 = vld [vmem:[%s1721_s4 + $0xb0] sm:$0xff]   ;;  %v1128_v4 = vunpack.c.l.bf16 %v1737_v1  ;;  %v1129_v16 = vunpack.c.h.bf16 %v1737_v1  ;;  %v1775_v21 = vld [vmem:[%s1721_s4 + $0xa0] sm:$0xff]   ;;  %v1120_v26 = vunpack.c.l.bf16 %v1772_v20  ;;  %s2130_s15 = smov (!%p273_p13, %s1612_s15), 1 }
  0x23   : > { %v1160_v5 = vunpack.c.l.bf16 %v1740_v2  ;;  %v1746_v6 = vld [vmem:[%s1721_s4 + $0xf0] sm:$0xff]   ;;  %v1778_v22 = vld [vmem:[%s1721_s4 + $0xe0] sm:$0xff]   ;;  %v1161_v23 = vunpack.c.h.bf16 %v1740_v2  ;;  %v1152_v27 = vunpack.c.l.bf16 %v1775_v21  ;;  %s1060_s23 = sshll.u32 %s2130_s15, 6  ;;  %s1061_s8 = sshll.u32 %s2130_s15, 7 }
  0x24   : > { %v1749_v7 = vld [vmem:[%s1727_s27 + $0x30] sm:$0xff]   ;;  %v1192_v10 = vunpack.c.l.bf16 %v1746_v6  ;;  %v1784_v28 = vld [vmem:[%s1727_s27 + $0x20] sm:$0xff]   ;;  %v1184_v33 = vunpack.c.l.bf16 %v1778_v22  ;;  %v1193_v63 = vunpack.c.h.bf16 %v1746_v6  ;;  %v1089_v6 = vunpack.c.h.bf16 %v1765_v15  ;;  %s1953_s7 = scalar_lea.vmem %s2117_s2, %s1060_s23  ;;  %s2063_s11 = scalar_lea.vmem %s2118_s3, %s1061_s8 }
  0x25   : > { %v1752_v8 = vld [vmem:[%s1727_s27 + $0x70] sm:$0xff]   ;;  %v1224_v11 = vunpack.c.l.bf16 %v1749_v7  ;;  %v1787_v29 = vld [vmem:[%s1727_s27 + $0x60] sm:$0xff]   ;;  %v1216_v34 = vunpack.c.l.bf16 %v1784_v28 }
  0x26   : > { %v1256_v12 = vunpack.c.l.bf16 %v1752_v8  ;;  %v1759_v13 = vld [vmem:[%s1727_s27 + $0xb0] sm:$0xff]   ;;  %v1790_v30 = vld [vmem:[%s1727_s27 + $0xa0] sm:$0xff]   ;;  %v1248_v39 = vunpack.c.l.bf16 %v1787_v29 }
  0x27   : > { %v1762_v14 = vld [vmem:[%s1727_s27 + $0xf0] sm:$0xff]   ;;  %v1288_v17 = vunpack.c.l.bf16 %v1759_v13  ;;  %v556_v24 = vmul.f32 %v1224_v11, %v1096_v3  ;;  %v1795_v35 = vld [vmem:[%s1727_s27 + $0xe0] sm:$0xff]   ;;  %v1280_v40 = vunpack.c.l.bf16 %v1790_v30  ;;  %v552_v45 = vmul.f32 %v1216_v34, %v1088_v19 }
  0x28   : > { %v1320_v18 = vunpack.c.l.bf16 %v1762_v14  ;;  %v572_v25 = vmul.f32 %v1256_v12, %v1128_v4  ;;  %v1798_v36 = vld [vmem:[%s1721_s4] sm:$0xff]   ;;  %v1312_v41 = vunpack.c.l.bf16 %v1795_v35  ;;  %v568_v53 = vmul.f32 %v1248_v39, %v1120_v26  ;;  %v1327_v34 = vld [vmem:[%s1721_s4 + $0x10] sm:$0xff]  }
  0x29   : > { %v588_v31 = vmul.f32 %v1288_v17, %v1160_v5  ;;  %v1801_v37 = vld [vmem:[%s1721_s4 + $0x40] sm:$0xff]   ;;  %v1072_v46 = vunpack.c.l.bf16 %v1798_v36  ;;  %v584_v54 = vmul.f32 %v1280_v40, %v1152_v27  ;;  %v1225_v4 = vunpack.c.h.bf16 %v1749_v7 }
  0x2a   : > { %v604_v32 = vmul.f32 %v1320_v18, %v1192_v10  ;;  %v644_v38 = vadd.f32 %v572_v25, %v556_v24  ;;  %v1807_v42 = vld [vmem:[%s1721_s4 + $0x80] sm:$0xff]   ;;  %v1104_v47 = vunpack.c.l.bf16 %v1801_v37  ;;  %v600_v55 = vmul.f32 %v1312_v41, %v1184_v33 }
  0x2b   : > { %v1810_v43 = vld [vmem:[%s1721_s4 + $0xc0] sm:$0xff]   ;;  %v1136_v48 = vunpack.c.l.bf16 %v1807_v42  ;;  %v632_v61 = vadd.f32 %v568_v53, %v552_v45  ;;  %v1257_v11 = vunpack.c.h.bf16 %v1752_v8  ;;  %v1289_v12 = vunpack.c.h.bf16 %v1759_v13 }
  0x2c   : > { %v1813_v44 = vld [vmem:[%s1727_s27] sm:$0xff]   ;;  %v645_v52 = vadd.f32 %v644_v38, %v588_v31  ;;  %v1168_v56 = vunpack.c.l.bf16 %v1810_v43  ;;  %v1321_v18 = vunpack.c.h.bf16 %v1762_v14  ;;  %v557_v19 = vmul.f32 %v1225_v4, %v1097_v9 }
  0x2d   : > { %v1819_v49 = vld [vmem:[%s1727_s27 + $0x40] sm:$0xff]   ;;  %v1200_v57 = vunpack.c.l.bf16 %v1813_v44  ;;  %v633_v5 = vadd.f32 %v632_v61, %v584_v54  ;;  %v573_v25 = vmul.f32 %v1257_v11, %v1129_v16  ;;  %v589_v7 = vmul.f32 %v1289_v12, %v1161_v23 }
  0x2e   : > { %v1822_v50 = vld [vmem:[%s1727_s27 + $0x80] sm:$0xff]   ;;  %v1232_v58 = vunpack.c.l.bf16 %v1819_v49  ;;  %v1831_v60 = vadd.f32 %v645_v52, %v604_v32  ;;  %v1121_v26 = vunpack.c.h.bf16 %v1772_v20  ;;  %v605_v31 = vmul.f32 %v1321_v18, %v1193_v63 }
  0x2f   : > { %v1825_v51 = vld [vmem:[%s1727_s27 + $0xc0] sm:$0xff]   ;;  %v1264_v59 = vunpack.c.l.bf16 %v1822_v50  ;;  %v544_v1 = vmul.f32 %v1200_v57, %v1072_v46  ;;  %v1843_v24 = vadd.f32 %v633_v5, %v600_v55  ;;  %v1153_v8 = vunpack.c.h.bf16 %v1775_v21  ;;  %v1351_v46 = vld [vmem:[%s1721_s4 + $0xd0] sm:$0xff]  }
  0x30   : > { %v1296_v62 = vunpack.c.l.bf16 %v1825_v51  ;;  %v560_v2 = vmul.f32 %v1232_v58, %v1104_v47  ;;  %680 = vadd.xlane.f32.xlu1 %v1831_v60  ;;  %v1185_v13 = vunpack.c.h.bf16 %v1778_v22  ;;  %v647_v0 = vadd.f32 %v573_v25, %v557_v19  ;;  %v1358_v47 = vld [vmem:[%s1727_s27 + $0x10] sm:$0xff]   ;;  %v1883_v19 = vld [vmem:[%s1721_s4 + $0x68] sm:$0xff]  }
  0x31   : > { %v576_v3 = vmul.f32 %v1264_v59, %v1136_v48  ;;  %672 = vadd.xlane.f32.xlu0 %v1843_v24  ;;  %v1217_v9 = vunpack.c.h.bf16 %v1784_v28  ;;  %v1249_v14 = vunpack.c.h.bf16 %v1787_v29  ;;  %v1281_v15 = vunpack.c.h.bf16 %v1790_v30  ;;  %v1335_v29 = vld [vmem:[%s1721_s4 + $0x50] sm:$0xff]  }
  0x32   : > { %v592_v10 = vmul.f32 %v1296_v62, %v1168_v56  ;;  %v608_v17 = vadd.f32 %v560_v2, %v544_v1  ;;  %v1313_v20 = vunpack.c.h.bf16 %v1795_v35  ;;  %v1073_v23 = vunpack.c.h.bf16 %v1798_v36  ;;  %v1366_v48 = vld [vmem:[%s1727_s27 + $0x50] sm:$0xff]  }
  0x33   : > { %v1105_v21 = vunpack.c.h.bf16 %v1801_v37  ;;  %v648_v32 = vadd.f32 %v647_v0, %v589_v7  ;;  %v553_v22 = vmul.f32 %v1217_v9, %v1089_v6  ;;  %v569_v33 = vmul.f32 %v1249_v14, %v1121_v26  ;;  %v1343_v37 = vld [vmem:[%s1721_s4 + $0x90] sm:$0xff]   ;;  %v1900_v14 = vld [vmem:[%s1727_s27 + $0x28] sm:$0xff]  }
  0x34   : > { %v609_v27 = vadd.f32 %v608_v17, %v576_v3  ;;  %v585_v28 = vmul.f32 %v1281_v15, %v1153_v8  ;;  %v601_v30 = vmul.f32 %v1313_v20, %v1185_v13  ;;  %v1137_v38 = vunpack.c.h.bf16 %v1807_v42  ;;  %v1382_v55 = vld [vmem:[%s1727_s27 + $0xd0] sm:$0xff]   ;;  %v1903_v15 = vld [vmem:[%s1727_s27 + $0x68] sm:$0xff]  }
  0x35   : > { %v1169_v35 = vunpack.c.h.bf16 %v1810_v43  ;;  %v1201_v36 = vunpack.c.h.bf16 %v1813_v44  ;;  %v1864_v39 = vadd.f32 %v648_v32, %v605_v31  ;;  %v635_v40 = vadd.f32 %v569_v33, %v553_v22  ;;  %v1374_v43 = vld [vmem:[%s1727_s27 + $0x90] sm:$0xff]   ;;  %v1894_v31 = vld [vmem:[%s1721_s4 + $0xe8] sm:$0xff]  }
  0x36   : > { %v1852_v16 = vadd.f32 %v609_v27, %v592_v10  ;;  %v1233_v41 = vunpack.c.h.bf16 %v1819_v49  ;;  %v1265_v45 = vunpack.c.h.bf16 %v1822_v50  ;;  %v1297_v52 = vunpack.c.h.bf16 %v1825_v51  ;;  %v1879_v10 = vld [vmem:[%s1721_s4 + $0x28] sm:$0xff]  }
  0x37   : > { %v545_v42 = vmul.f32 %v1201_v36, %v1073_v23  ;;  %v1081_v53 = vunpack.c.h.bf16 %v1327_v34  ;;  %v1113_v54 = vunpack.c.h.bf16 %v1335_v29  ;;  %v636_v44 = vadd.f32 %v635_v40, %v585_v28  ;;  %v1891_v27 = vld [vmem:[%s1721_s4 + $0xa8] sm:$0xff]   ;;  %v1913_v28 = vld [vmem:[%s1721_s4 + $0x38] sm:$0xff]  }
  0x38   : > { %656 = vadd.xlane.f32.xlu2 %v1852_v16  ;;  %682 = vadd.xlane.f32.xlu1 %v1864_v39  ;;  %v561_v56 = vmul.f32 %v1233_v41, %v1105_v21  ;;  %v577_v57 = vmul.f32 %v1265_v45, %v1137_v38  ;;  %v1145_v49 = vunpack.c.h.bf16 %v1343_v37  ;;  %v593_v58 = vmul.f32 %v1297_v52, %v1169_v35  ;;  %v1906_v20 = vld [vmem:[%s1727_s27 + $0xa8] sm:$0xff]   ;;  %v1922_v36 = vld [vmem:[%s1721_s4 + $0xb8] sm:$0xff]  }
  0x39   : > { %v1177_v50 = vunpack.c.h.bf16 %v1351_v46  ;;  %v1209_v59 = vunpack.c.h.bf16 %v1358_v47  ;;  %v1241_v61 = vunpack.c.h.bf16 %v1366_v48  ;;  %v1876_v51 = vadd.f32 %v636_v44, %v601_v30  ;;  %v1910_v33 = vld [vmem:[%s1727_s27 + $0xe8] sm:$0xff]  }
  0x3a   : > { %v611_v62 = vadd.f32 %v561_v56, %v545_v42  ;;  %v1273_v63 = vunpack.c.h.bf16 %v1374_v43  ;;  %v1305_v1 = vunpack.c.h.bf16 %v1382_v55  ;;  %v1080_v4 = vunpack.c.l.bf16 %v1327_v34  ;;  %v1916_v34 = vld [vmem:[%s1721_s4 + $0x78] sm:$0xff]  }
  0x3b   : > { %v549_v2 = vmul.f32 %v1209_v59, %v1081_v53  ;;  %v565_v3 = vmul.f32 %v1241_v61, %v1113_v54  ;;  %v1112_v5 = vunpack.c.l.bf16 %v1335_v29  ;;  %674 = vadd.xlane.f32.xlu0 %v1876_v51  ;;  %v1144_v18 = vunpack.c.l.bf16 %v1343_v37  ;;  %v1940_v54 = vld [vmem:[%s1727_s27 + $0x78] sm:$0xff]  }
  0x3c   : > { %v612_v11 = vadd.f32 %v611_v62, %v577_v57  ;;  %v581_v12 = vmul.f32 %v1273_v63, %v1145_v49  ;;  %v597_v17 = vmul.f32 %v1305_v1, %v1177_v50  ;;  %v1176_v25 = vunpack.c.l.bf16 %v1351_v46  ;;  %v1930_v46 = vld [vmem:[%s1721_s4 + $0xf8] sm:$0xff]  }
  0x3d   : > { %v623_v6 = vadd.f32 %v565_v3, %v549_v2  ;;  %v1208_v7 = vunpack.c.l.bf16 %v1358_v47  ;;  %v1240_v26 = vunpack.c.l.bf16 %v1366_v48  ;;  %v1272_v13 = vunpack.c.l.bf16 %v1374_v43  ;;  %v1933_v47 = vld [vmem:[%s1727_s27 + $0x38] sm:$0xff]  }
  0x3e   : > { %v1896_v8 = vadd.f32 %v612_v11, %v593_v58  ;;  %v1304_v0 = vunpack.c.l.bf16 %v1382_v55  ;;  %v1092_v9 = vunpack.c.l.bf16 %v1879_v10  ;;  %v1124_v22 = vunpack.c.l.bf16 %v1883_v19  ;;  %v1943_v43 = vld [vmem:[%s1727_s27 + $0xb8] sm:$0xff]  }
  0x3f   : > { %v624_v23 = vadd.f32 %v623_v6, %v581_v12  ;;  %v548_v21 = vmul.f32 %v1208_v7, %v1080_v4  ;;  %v564_v32 = vmul.f32 %v1240_v26, %v1112_v5  ;;  %v580_v29 = vmul.f32 %v1272_v13, %v1144_v18  ;;  %v1948_v49 = vld [vmem:[%s1727_s27 + $0xf8] sm:$0xff]  }
  0x40   : > { %658 = vadd.xlane.f32.xlu2 %v1896_v8  ;;  %v596_v30 = vmul.f32 %v1304_v0, %v1176_v25  ;;  %v1156_v38 = vunpack.c.l.bf16 %v1891_v27  ;;  %v1188_v35 = vunpack.c.l.bf16 %v1894_v31  ;;  %v1220_v41 = vunpack.c.l.bf16 %v1900_v14  ;;  %v1069_v12 = vld [vmem:[%s1953_s7 + $0x38] sm:$0xff] }
  0x41   : > { %v1925_v37 = vadd.f32 %v624_v23, %v597_v17  ;;  %v620_v40 = vadd.f32 %v564_v32, %v548_v21  ;;  %v1252_v45 = vunpack.c.l.bf16 %v1903_v15  ;;  %v1284_v48 = vunpack.c.l.bf16 %v1906_v20  ;;  %808 = vmatpush.bf16.msra.mxu0 %v1069_v12  ;;  %1389 = vmatpush.bf16.msra.mxu2 %v1069_v12  ;;  %v1978_v32 = vld [vmem:[%s1721_s4 + $0x8] sm:$0xff]  }
  0x42   : > { %v1316_v52 = vunpack.c.l.bf16 %v1910_v33  ;;  %v1100_v42 = vunpack.c.l.bf16 %v1913_v28  ;;  %v1132_v53 = vunpack.c.l.bf16 %v1916_v34  ;;  %v554_v44 = vmul.f32 %v1220_v41, %v1092_v9  ;;  %1390 = vmatpush.bf16.msra.mxu3 %v1069_v12  ;;  %1388 = vmatpush.bf16.msra.mxu1 %v1069_v12  ;;  %v1992_v41 = vld [vmem:[%s1721_s4 + $0xc8] sm:$0xff]  }
  0x43   : > { %666 = vadd.xlane.f32.xlu1 %v1925_v37  ;;  %v621_v55 = vadd.f32 %v620_v40, %v580_v29  ;;  %v570_v56 = vmul.f32 %v1252_v45, %v1124_v22  ;;  %v1164_v57 = vunpack.c.l.bf16 %v1922_v36  ;;  %v586_v58 = vmul.f32 %v1284_v48, %v1156_v38  ;;  %v1989_v40 = vld [vmem:[%s1721_s4 + $0x88] sm:$0xff]  }
  0x44   : > { %v602_v50 = vmul.f32 %v1316_v52, %v1188_v35  ;;  %v1196_v59 = vunpack.c.l.bf16 %v1930_v46  ;;  %v1228_v61 = vunpack.c.l.bf16 %v1933_v47  ;;  %v1260_v1 = vunpack.c.l.bf16 %v1940_v54  ;;  %v1067_v45 = vld [vmem:[%s1953_s7 + $0x28] sm:$0xff] }
  0x45   : > { %v1957_v62 = vadd.f32 %v621_v55, %v596_v30  ;;  %v638_v63 = vadd.f32 %v570_v56, %v554_v44  ;;  %v1292_v2 = vunpack.c.l.bf16 %v1943_v43  ;;  %v1324_v3 = vunpack.c.l.bf16 %v1948_v49  ;;  %v1983_v30 = vld [vmem:[%s1721_s4 + $0x48] sm:$0xff]  }
  0x46   : > { %v558_v4 = vmul.f32 %v1228_v61, %v1100_v42  ;;  %v1093_v5 = vunpack.c.h.bf16 %v1879_v10  ;;  %v1125_v11 = vunpack.c.h.bf16 %v1883_v19  ;;  %v574_v18 = vmul.f32 %v1260_v1, %v1132_v53  ;;  %v1068_v10 = vld [vmem:[%s1953_s7 + $0x30] sm:$0xff]  ;;  %v1365_v42 = vld [vmem:[%s1727_s27 + $0x48] sm:$0xff]  }
  0x47   : > { %664 = vadd.xlane.f32.xlu0 %v1957_v62  ;;  %v639_v17 = vadd.f32 %v638_v63, %v586_v58  ;;  %v590_v6 = vmul.f32 %v1292_v2, %v1164_v57  ;;  %v1157_v25 = vunpack.c.h.bf16 %v1891_v27  ;;  %v606_v7 = vmul.f32 %v1324_v3, %v1196_v59  ;;  %809 = vmatpush.bf16.msra.mxu0 %v1068_v10  ;;  %v1373_v56 = vld [vmem:[%s1727_s27 + $0x88] sm:$0xff]  }
  0x48   : > { %v1189_v26 = vunpack.c.h.bf16 %v1894_v31  ;;  %v1221_v13 = vunpack.c.h.bf16 %v1900_v14  ;;  %v1253_v0 = vunpack.c.h.bf16 %v1903_v15  ;;  %v650_v9 = vadd.f32 %v574_v18, %v558_v4  ;;  %1392 = vmatpush.bf16.msra.mxu2 %v1068_v10  ;;  %1393 = vmatpush.bf16.msra.mxu3 %v1068_v10  ;;  %v1381_v57 = vld [vmem:[%s1727_s27 + $0xc8] sm:$0xff]  }
  0x49   : > { %v1971_v19 = vadd.f32 %v639_v17, %v602_v50  ;;  %v1285_v23 = vunpack.c.h.bf16 %v1906_v20  ;;  %v1317_v21 = vunpack.c.h.bf16 %v1910_v33  ;;  %v1101_v14 = vunpack.c.h.bf16 %v1913_v28  ;;  %1391 = vmatpush.bf16.msra.mxu1 %v1068_v10  ;;  %v1344_v10 = vld [vmem:[%s1721_s4 + $0x98] sm:$0xff]  }
  0x4a   : > { %v555_v27 = vmul.f32 %v1221_v13, %v1093_v5  ;;  %v571_v31 = vmul.f32 %v1253_v0, %v1125_v11  ;;  %v1133_v15 = vunpack.c.h.bf16 %v1916_v34  ;;  %v651_v22 = vadd.f32 %v650_v9, %v590_v6  ;;  %v1328_v6 = vld [vmem:[%s1721_s4 + $0x18] sm:$0xff]  }
  0x4b   : > { %676 = vadd.xlane.f32.xlu2 %v1971_v19  ;;  %v587_v29 = vmul.f32 %v1285_v23, %v1157_v25  ;;  %v603_v20 = vmul.f32 %v1317_v21, %v1189_v26  ;;  %v1165_v33 = vunpack.c.h.bf16 %v1922_v36  ;;  %v1197_v35 = vunpack.c.h.bf16 %v1930_v46  ;;  %810 = vmatpush.bf16.msra.mxu0 %v1067_v45  ;;  %v1336_v25 = vld [vmem:[%s1721_s4 + $0x58] sm:$0xff]  }
  0x4c   : > { %v641_v38 = vadd.f32 %v571_v31, %v555_v27  ;;  %v1229_v28 = vunpack.c.h.bf16 %v1933_v47  ;;  %v1261_v34 = vunpack.c.h.bf16 %v1940_v54  ;;  %v1995_v36 = vadd.f32 %v651_v22, %v606_v7  ;;  %v1357_v47 = vld [vmem:[%s1727_s27 + $0x8] sm:$0xff]   ;;  %1395 = vmatpush.bf16.msra.mxu2 %v1067_v45  ;;  %1396 = vmatpush.bf16.msra.mxu3 %v1067_v45  ;;  %v1359_v31 = vld [vmem:[%s1727_s27 + $0x18] sm:$0xff]  }
  0x4d   : > { %v1293_v48 = vunpack.c.h.bf16 %v1943_v43  ;;  %v1325_v52 = vunpack.c.h.bf16 %v1948_v49  ;;  %v1077_v46 = vunpack.c.h.bf16 %v1978_v32  ;;  %v1109_v44 = vunpack.c.h.bf16 %v1983_v30  ;;  %1394 = vmatpush.bf16.msra.mxu1 %v1067_v45  ;;  %v1383_v45 = vld [vmem:[%s1727_s27 + $0xd8] sm:$0xff]  }
  0x4e   : > { %v642_v53 = vadd.f32 %v641_v38, %v587_v29  ;;  %v559_v54 = vmul.f32 %v1229_v28, %v1101_v14  ;;  %v575_v55 = vmul.f32 %v1261_v34, %v1133_v15  ;;  %684 = vadd.xlane.f32.xlu1 %v1995_v36  ;;  %v1141_v43 = vunpack.c.h.bf16 %v1989_v40  ;;  %v1367_v14 = vld [vmem:[%s1727_s27 + $0x58] sm:$0xff]  }
  0x4f   : > { %v591_v58 = vmul.f32 %v1293_v48, %v1165_v33  ;;  %v607_v50 = vmul.f32 %v1325_v52, %v1197_v35  ;;  %v1173_v49 = vunpack.c.h.bf16 %v1992_v41  ;;  %v1205_v63 = vunpack.c.h.bf16 %v1357_v47  ;;  %v1375_v33 = vld [vmem:[%s1727_s27 + $0x98] sm:$0xff]  }
  0x50   : > { %v2008_v59 = vadd.f32 %v642_v53, %v603_v20  ;;  %v653_v61 = vadd.f32 %v575_v55, %v559_v54  ;;  %v1237_v1 = vunpack.c.h.bf16 %v1365_v42  ;;  %v1269_v2 = vunpack.c.h.bf16 %v1373_v56  ;;  %v1352_v20 = vld [vmem:[%s1721_s4 + $0xd8] sm:$0xff]  }
  0x51   : > { %v1301_v3 = vunpack.c.h.bf16 %v1381_v57  ;;  %v1076_v4 = vunpack.c.l.bf16 %v1978_v32  ;;  %v1108_v5 = vunpack.c.l.bf16 %v1983_v30  ;;  %v547_v12 = vmul.f32 %v1205_v63, %v1077_v46 }
  0x52   : > { %678 = vadd.xlane.f32.xlu0 %v2008_v59  ;;  %v654_v11 = vadd.f32 %v653_v61, %v591_v58  ;;  %v563_v17 = vmul.f32 %v1237_v1, %v1109_v44  ;;  %v1140_v18 = vunpack.c.l.bf16 %v1989_v40  ;;  %v579_v7 = vmul.f32 %v1269_v2, %v1141_v43 }
  0x53   : > { %v595_v26 = vmul.f32 %v1301_v3, %v1173_v49  ;;  %v1172_v13 = vunpack.c.l.bf16 %v1992_v41  ;;  %v1204_v0 = vunpack.c.l.bf16 %v1357_v47  ;;  %v1236_v21 = vunpack.c.l.bf16 %v1365_v42 }
  0x54   : > { %v2018_v9 = vadd.f32 %v654_v11, %v607_v50  ;;  %v617_v23 = vadd.f32 %v563_v17, %v547_v12  ;;  %v1268_v27 = vunpack.c.l.bf16 %v1373_v56  ;;  %v1300_v15 = vunpack.c.l.bf16 %v1381_v57 }
  0x55   : > { %v546_v32 = vmul.f32 %v1204_v0, %v1076_v4  ;;  %v1085_v22 = vunpack.c.h.bf16 %v1328_v6  ;;  %v1117_v29 = vunpack.c.h.bf16 %v1336_v25  ;;  %v562_v38 = vmul.f32 %v1236_v21, %v1108_v5  ;;  %v1064_v0 = vld [vmem:[%s1953_s7 + $0x10] sm:$0xff]  ;;  %v1062_v21 = vld [vmem:[%s1953_s7] sm:$0xff] }
  0x56   : > { %686 = vadd.xlane.f32.xlu2 %v2018_v9  ;;  %v618_v30 = vadd.f32 %v617_v23, %v579_v7  ;;  %v578_v35 = vmul.f32 %v1268_v27, %v1140_v18  ;;  %v1149_v28 = vunpack.c.h.bf16 %v1344_v10  ;;  %v594_v34 = vmul.f32 %v1300_v15, %v1172_v13  ;;  %v1065_v13 = vld [vmem:[%s1953_s7 + $0x18] sm:$0xff] }
  0x57   : > { %v1213_v40 = vunpack.c.h.bf16 %v1359_v31  ;;  %v1245_v41 = vunpack.c.h.bf16 %v1367_v14  ;;  %v614_v52 = vadd.f32 %v562_v38, %v546_v32  ;;  %v1181_v46 = vunpack.c.h.bf16 %v1352_v20 }
  0x58   : > { %v2026_v48 = vadd.f32 %v618_v30, %v595_v26  ;;  %v1277_v47 = vunpack.c.h.bf16 %v1375_v33  ;;  %v1084_v54 = vunpack.c.l.bf16 %v1328_v6  ;;  %v1116_v55 = vunpack.c.l.bf16 %v1336_v25  ;;  %v1066_v26 = vld [vmem:[%s1953_s7 + $0x20] sm:$0xff] }
  0x59   : > { %v551_v42 = vmul.f32 %v1213_v40, %v1085_v22  ;;  %v567_v53 = vmul.f32 %v1245_v41, %v1117_v29  ;;  %v615_v44 = vadd.f32 %v614_v52, %v578_v35  ;;  %v1309_v56 = vunpack.c.h.bf16 %v1383_v45  ;;  %811 = vmatpush.bf16.msra.mxu0 %v1066_v26  ;;  %1398 = vmatpush.bf16.msra.mxu2 %v1066_v26 }
  0x5a   : > { %662 = vadd.xlane.f32.xlu1 %v2026_v48  ;;  %v583_v57 = vmul.f32 %v1277_v47, %v1149_v28  ;;  %v1148_v58 = vunpack.c.l.bf16 %v1344_v10  ;;  %v1180_v43 = vunpack.c.l.bf16 %v1352_v20  ;;  %v1212_v49 = vunpack.c.l.bf16 %v1359_v31  ;;  %1399 = vmatpush.bf16.msra.mxu3 %v1066_v26  ;;  %v1063_v10 = vld [vmem:[%s1953_s7 + $0x8] sm:$0xff] }
  0x5b   : > { %v629_v50 = vadd.f32 %v567_v53, %v551_v42  ;;  %v1244_v61 = vunpack.c.l.bf16 %v1367_v14  ;;  %v2029_v63 = vadd.f32 %v615_v44, %v594_v34  ;;  %v1276_v1 = vunpack.c.l.bf16 %v1375_v33  ;;  %1397 = vmatpush.bf16.msra.mxu1 %v1066_v26 }
  0x5c   : > { %v1308_v2 = vunpack.c.l.bf16 %v1383_v45  ;;  %v550_v3 = vmul.f32 %v1212_v49, %v1084_v54  ;;  %v599_v5 = vmul.f32 %v1309_v56, %v1181_v46 }
  0x5d   : > { %v566_v4 = vmul.f32 %v1244_v61, %v1116_v55  ;;  %660 = vadd.xlane.f32.xlu0 %v2029_v63  ;;  %v630_v11 = vadd.f32 %v629_v50, %v583_v57  ;;  %v582_v12 = vmul.f32 %v1276_v1, %v1148_v58  ;;  %812 = vmatpush.bf16.msra.mxu0 %v1065_v13 }
  0x5e   : > { %v598_v17 = vmul.f32 %v1308_v2, %v1180_v43  ;;  %1401 = vmatpush.bf16.msra.mxu2 %v1065_v13  ;;  %1402 = vmatpush.bf16.msra.mxu3 %v1065_v13 }
  0x5f   : > { %v626_v18 = vadd.f32 %v566_v4, %v550_v3  ;;  %v2032_v25 = vadd.f32 %v630_v11, %v599_v5  ;;  %1400 = vmatpush.bf16.msra.mxu1 %v1065_v13 }
  0x61   : > { %v627_v6 = vadd.f32 %v626_v18, %v582_v12  ;;  %813 = vmatpush.bf16.msra.mxu0 %v1064_v0 }
  0x62   : > { %1404 = vmatpush.bf16.msra.mxu2 %v1064_v0  ;;  %1405 = vmatpush.bf16.msra.mxu3 %v1064_v0 }
  0x63   : > { %v2034_v7 = vadd.f32 %v627_v6, %v598_v17  ;;  %1403 = vmatpush.bf16.msra.mxu1 %v1064_v0 }
  0x65   : > { %668 = vadd.xlane.f32.xlu2 %v2034_v7  ;;  %670 = vadd.xlane.f32.xlu0 %v2032_v25 }
  0x66   : > { %814 = vmatpush.bf16.msra.mxu0 %v1063_v10  ;;  %1407 = vmatpush.bf16.msra.mxu2 %v1063_v10 }
  0x67   : > { %1408 = vmatpush.bf16.msra.mxu3 %v1063_v10  ;;  %1406 = vmatpush.bf16.msra.mxu1 %v1063_v10 }
  0x6a   : > { %815 = vmatpush.bf16.msra.mxu0 %v1062_v21  ;;  %1410 = vmatpush.bf16.msra.mxu2 %v1062_v21 }
  0x6b   : > { %1411 = vmatpush.bf16.msra.mxu3 %v1062_v21  ;;  %1409 = vmatpush.bf16.msra.mxu1 %v1062_v21 }
  0xa3   : > { %v681_v23 = vpop.xlane.xlu1 %680 }
  0xa4   : > { %v673_v27 = vpop.xlane.xlu0 %672  ;;  %v700_v31 = vadd.f32 4e-05, %v681_v23 }
  0xa5   : > { %v696_v32 = vadd.f32 4e-05, %v673_v27 }
  0xa6   : > { %1474 = vrcp.f32 %v700_v31 }
  0xab   : > { %v657_v14 = vpop.xlane.xlu2 %656  ;;  %v683_v15 = vpop.xlane.xlu1 %682 }
  0xac   : > { %v701_v22 = vadd.f32 4e-05, %v683_v15  ;;  %v688_v29 = vadd.f32 4e-05, %v657_v14  ;;  %v1475_v33 = vpop.eup %1474 }
  0xad   : > { %v732_v35 = vmul.f32 %v1475_v33, %v1831_v60 }
  0xae   : > { %1476 = vrcp.f32 %v701_v22  ;;  %v675_v20 = vpop.xlane.xlu0 %674 }
  0xaf   : > { %1478 = vrcp.f32 %v696_v32  ;;  %v697_v30 = vadd.f32 4e-05, %v675_v20 }
  0xb0   : > { %1480 = vrcp.f32 %v688_v29 }
  0xb1   : > { %1482 = vrcp.f32 %v697_v30 }
  0xb3   : > { %v659_v38 = vpop.xlane.xlu2 %658 }
  0xb4   : > { %v1477_v28 = vpop.eup %1476  ;;  %v689_v34 = vadd.f32 4e-05, %v659_v38 }
  0xb5   : > { %v733_v40 = vmul.f32 %v1477_v28, %v1864_v39  ;;  %v1479_v41 = vpop.eup %1478 }
  0xb6   : > { %1484 = vrcp.f32 %v689_v34  ;;  %v667_v45 = vpop.xlane.xlu1 %666  ;;  %v1481_v52 = vpop.eup %1480  ;;  %v728_v53 = vmul.f32 %v1479_v41, %v1843_v24 }
  0xb7   : > { %v693_v46 = vadd.f32 4e-05, %v667_v45  ;;  %v742_v47 = vpack.c.bf16 %v733_v40, %v732_v35  ;;  %v1483_v42 = vpop.eup %1482  ;;  %v720_v60 = vmul.f32 %v1481_v52, %v1852_v16 }
  0xb8   : > { %v729_v54 = vmul.f32 %v1483_v42, %v1876_v51 }
  0xb9   : > { %1486 = vrcp.f32 %v693_v46  ;;  %846 = vmatmul.bf16.vlgmr.msra.gmra.mxu3 %v742_v47 }
  0xba   : > { %v665_v55 = vpop.xlane.xlu0 %664  ;;  %v740_v56 = vpack.c.bf16 %v729_v54, %v728_v53 }
  0xbb   : > { %v692_v44 = vadd.f32 4e-05, %v665_v55 }
  0xbc   : > { %v1485_v57 = vpop.eup %1484  ;;  %836 = vmatmul.bf16.vlgmr.msra.gmra.mxu2 %v740_v56 }
  0xbd   : > { %1488 = vrcp.f32 %v692_v44  ;;  %v721_v39 = vmul.f32 %v1485_v57, %v1896_v8 }
  0xbe   : > { %v677_v50 = vpop.xlane.xlu2 %676 }
  0xbf   : > { %v1487_v58 = vpop.eup %1486  ;;  %v736_v43 = vpack.c.bf16 %v721_v39, %v720_v60  ;;  %v698_v49 = vadd.f32 4e-05, %v677_v50 }
  0xc0   : > { %v725_v24 = vmul.f32 %v1487_v58, %v1925_v37 }
  0xc1   : > { %816 = vmatmul.bf16.vlgmr.msra.gmra.mxu0 %v736_v43  ;;  %v685_v61 = vpop.xlane.xlu1 %684  ;;  %1490 = vrcp.f32 %v698_v49 }
  0xc2   : > { %v702_v1 = vadd.f32 4e-05, %v685_v61 }
  0xc3   : > { %v1489_v51 = vpop.eup %1488 }
  0xc4   : > { %v724_v2 = vmul.f32 %v1489_v51, %v1957_v62  ;;  %1492 = vrcp.f32 %v702_v1 }
  0xc5   : > { %v679_v16 = vpop.xlane.xlu0 %678 }
  0xc6   : > { %v699_v3 = vadd.f32 4e-05, %v679_v16  ;;  %v738_v4 = vpack.c.bf16 %v725_v24, %v724_v2 }
  0xc7   : > { %v1491_v5 = vpop.eup %1490 }
  0xc8   : > { %1494 = vrcp.f32 %v699_v3  ;;  %826 = vmatmul.bf16.vlgmr.msra.gmra.mxu1 %v738_v4  ;;  %v730_v18 = vmul.f32 %v1491_v5, %v1971_v19 }
  0xc9   : > { %v687_v8 = vpop.xlane.xlu2 %686 }
  0xca   : > { %v703_v11 = vadd.f32 4e-05, %v687_v8  ;;  %v1493_v12 = vpop.eup %1492 }
  0xcb   : > { %v734_v0 = vmul.f32 %v1493_v12, %v1995_v36 }
  0xcc   : > { %1496 = vrcp.f32 %v703_v11 }
  0xcd   : > { %v663_v17 = vpop.xlane.xlu1 %662 }
  0xce   : > { %v1495_v37 = vpop.eup %1494  ;;  %v691_v6 = vadd.f32 4e-05, %v663_v17 }
  0xcf   : > { %v731_v26 = vmul.f32 %v1495_v37, %v2008_v59 }
  0xd0   : > { %1498 = vrcp.f32 %v691_v6  ;;  %v661_v62 = vpop.xlane.xlu0 %660 }
  0xd1   : > { %v741_v13 = vpack.c.bf16 %v731_v26, %v730_v18  ;;  %v690_v23 = vadd.f32 4e-05, %v661_v62 }
  0xd2   : > { %v1497_v10 = vpop.eup %1496 }
  0xd3   : > { %841 = vmatmul.bf16.gmra.mxu2 %v741_v13  ;;  %v735_v21 = vmul.f32 %v1497_v10, %v2018_v9  ;;  %1500 = vrcp.f32 %v690_v23 }
  0xd5   : > { %v743_v27 = vpack.c.bf16 %v735_v21, %v734_v0 }
  0xd6   : > { %v1499_v31 = vpop.eup %1498 }
  0xd7   : > { %851 = vmatmul.bf16.gmra.mxu3 %v743_v27  ;;  %v723_v59 = vmul.f32 %v1499_v31, %v2026_v48 }
  0xd8   : > { %v669_v14 = vpop.xlane.xlu2 %668  ;;  %v671_v19 = vpop.xlane.xlu0 %670 }
  0xd9   : > { %v694_v15 = vadd.f32 4e-05, %v669_v14  ;;  %v1501_v32 = vpop.eup %1500  ;;  %v695_v22 = vadd.f32 4e-05, %v671_v19 }
  0xda   : > { %v722_v36 = vmul.f32 %v1501_v32, %v2029_v63 }
  0xdb   : > { %1502 = vrcp.f32 %v694_v15 }
  0xdc   : > { %1504 = vrcp.f32 %v695_v22  ;;  %v737_v29 = vpack.c.bf16 %v723_v59, %v722_v36 }
  0xde   : > { %821 = vmatmul.bf16.gmra.mxu0 %v737_v29 }
  0xe1   : > { %v1503_v20 = vpop.eup %1502 }
  0xe2   : > { %v1505_v9 = vpop.eup %1504  ;;  %v726_v33 = vmul.f32 %v1503_v20, %v2034_v7 }
  0xe3   : > { %v727_v30 = vmul.f32 %v1505_v9, %v2032_v25 }
  0xe5   : > { %v739_v38 = vpack.c.bf16 %v727_v30, %v726_v33 }
  0xe7   : > { %831 = vmatmul.bf16.gmra.mxu1 %v739_v38 }
 0x13c   : > { %v847_v48 = vpop.f32.mrf.mxu3 }
 0x13d   : > { %870 = vst.msk [vmem:[%s2063_s11 + $0x60] sm:$0xff] %vm857_vm0, %v847_v48 }
 0x13e   : > { %v817_v63 = vpop.f32.mrf.mxu0 }
 0x13f   : > { %858 = vst.msk [vmem:[%s2063_s11] sm:$0xff] %vm857_vm0, %v817_v63  ;;  %v837_v25 = vpop.f32.mrf.mxu2 }
 0x140   : > { %866 = vst.msk [vmem:[%s2063_s11 + $0x40] sm:$0xff] %vm857_vm0, %v837_v25 }
 0x144   : > { %v849_v7 = vpop.f32.mrf.mxu3 }
 0x145   : > { %v827_v35 = vpop.f32.mrf.mxu1  ;;  %871 = vst.msk [vmem:[%s2063_s11 + $0x68] sm:$0xff] %vm857_vm0, %v849_v7 }
 0x146   : > { %v819_v28 = vpop.f32.mrf.mxu0  ;;  %862 = vst.msk [vmem:[%s2063_s11 + $0x20] sm:$0xff] %vm857_vm0, %v827_v35 }
 0x147   : > { %859 = vst.msk [vmem:[%s2063_s11 + $0x8] sm:$0xff] %vm857_vm0, %v819_v28  ;;  %v839_v34 = vpop.f32.mrf.mxu2 }
 0x148   : > { %867 = vst.msk [vmem:[%s2063_s11 + $0x48] sm:$0xff] %vm857_vm0, %v839_v34 }
 0x14d   : > { %v829_v40 = vpop.f32.mrf.mxu1 }
 0x14e   : > { %863 = vst.msk [vmem:[%s2063_s11 + $0x28] sm:$0xff] %vm857_vm0, %v829_v40 }
 0x156   : > { %v842_v41 = vpop.f32.mrf.mxu2 }
 0x157   : > { %868 = vst.msk [vmem:[%s2063_s11 + $0x50] sm:$0xff] %vm857_vm0, %v842_v41 }
 0x15a   : > { %v852_v45 = vpop.f32.mrf.mxu3 }
 0x15b   : > { %872 = vst.msk [vmem:[%s2063_s11 + $0x70] sm:$0xff] %vm857_vm0, %v852_v45  ;;  %v822_v52 = vpop.f32.mrf.mxu0 }
 0x15c   : > { %860 = vst.msk [vmem:[%s2063_s11 + $0x10] sm:$0xff] %vm857_vm0, %v822_v52 }
 0x15e   : > { %v844_v46 = vpop.f32.mrf.mxu2 }
 0x15f   : > { %869 = vst.msk [vmem:[%s2063_s11 + $0x58] sm:$0xff] %vm857_vm0, %v844_v46 }
 0x162   : > { %v854_v47 = vpop.f32.mrf.mxu3 }
 0x163   : > { %873 = vst.msk [vmem:[%s2063_s11 + $0x78] sm:$0xff] %vm857_vm0, %v854_v47  ;;  %v824_v42 = vpop.f32.mrf.mxu0 }
 0x164   : > { %v832_v53 = vpop.f32.mrf.mxu1  ;;  %861 = vst.msk [vmem:[%s2063_s11 + $0x18] sm:$0xff] %vm857_vm0, %v824_v42 }
 0x165   : > { %864 = vst.msk [vmem:[%s2063_s11 + $0x30] sm:$0xff] %vm857_vm0, %v832_v53 }
 0x16c   : > { %v834_v54 = vpop.f32.mrf.mxu1 }
 0x16d   : > { %865 = vst.msk [vmem:[%s2063_s11 + $0x38] sm:$0xff] %vm857_vm0, %v834_v54 }
 0x16e PF: > { %s19_s17 = sadd.s32 1, %s1620_s17   ;;  %s2122_s12 = smov %s1604_s13 }
 0x16f   : > { %p16_p0 = scmp.ge.s32.totalorder %s19_s17, 4   ;;  %s2123_s13 = smov %s1608_s14 }
 0x170   : > { %s2124_s14 = smov %s1693_s24  ;;  %s2125_s15 = smov %s1616_s16 }
 0x171   : > { %s2126_s16 = smov %s2128_s19  ;;  %18 = sbr.rel (!%p16_p0) target bundleno = 6 (0x6), region = 88 }
 0x176   :  { %904 = vsyncpa [#allocation3], 1 }
 0x177   :  { %906 = vsyncpa [#allocation3 + $0x1], 1 }
 0x178   :  { %907 = vsyncpa [#allocation5], 1 }
 0x179   :  { %909 = vsyncpa [#allocation5 + $0x1], 1 }

</bundles_post_ra>
